<compile_context>
chip_gen: v6e
topology: v6e:2x2x1
jax: 0.10.0
libtpu: 0.0.40
codegen_flags: <defaults>
</compile_context>

<pallas_src>
import jax
import jax.numpy as jnp
from jax import lax
from jax.experimental import pallas as pl
from jax.experimental.pallas import tpu as pltpu

KSIZE = 7
PAD = 3
OFF0 = 128  # lane offset of the data row inside the haloed scratch
            # (vreg-aligned interior store; columns [OFF0-PAD, OFF0) stay zero)


def _tpu_params():
    """Best-effort (per-core VMEM bytes, #TensorCores per chip); safe defaults."""
    vmem_bytes = None
    try:
        info = pltpu.get_tpu_info()
        v = int(getattr(info, "vmem_capacity_bytes", 0) or 0)
        if v > 0:
            vmem_bytes = v
    except Exception:
        pass
    kind = ""
    try:
        kind = jax.devices()[0].device_kind.lower()
    except Exception:
        pass
    is_v7 = ("v7" in kind) or ("7x" in kind)
    if vmem_bytes is None:
        # Unknown -> assume the smallest VMEM (v7x, 64 MiB/TC): always safe.
        vmem_bytes = 64 * 1024 * 1024 if (is_v7 or not kind) else 128 * 1024 * 1024
    n_tc = 2 if (is_v7 or vmem_bytes <= 64 * 1024 * 1024) else 1
    return vmem_bytes, n_tc


def cbam_block_pallas(x, conv_w, *, force_c_split=False):
    """x: (N, C, L); conv_w: (1, 2, KSIZE) = PyTorch Conv1d(2, 1, 7, bias=False) weight."""
    N, C, L = (int(d) for d in x.shape)
    itemsize = jnp.dtype(x.dtype).itemsize

    # Fold the 1/C of the channel mean into the avg-row weights: the kernel
    # then only needs a running channel *sum*.
    w2d = conv_w.reshape(2, KSIZE).astype(jnp.float32)
    w_scaled = w2d * jnp.array([[1.0 / C], [1.0]], dtype=jnp.float32)

    # ---- generation-aware tile sizing (kernel is HBM-bandwidth bound) ------
    vmem_bytes, n_tc = _tpu_params()
    if vmem_bytes >= 96 * 1024 * 1024:        # v5e / v6e: 128 MiB VMEM, 1 core
        target_block = 12 * 1024 * 1024       #   bigger tiles, higher limit
    else:                                     # v7x-class: 64 MiB VMEM per core
        target_block = 4 * 1024 * 1024        #   3-4 MiB tiles sit on the roofline

    row_bytes = L * itemsize
    # Channel tile: whole C in one block when it fits (single HBM read of x);
    # otherwise a sublane-friendly (multiple-of-8) tile and a two-phase pass.
    if (not force_c_split) and C * row_bytes <= target_block:
        tc = C
    else:
        tc = max(1, min(C, target_block // max(1, row_bytes)))
        if force_c_split and C > 1:
            tc = min(tc, max(1, C // 2))
        if tc < C:
            tc = min(C, max(8, (tc // 8) * 8))
    grid_c = pl.cdiv(C, tc)
    c_rem = C - (grid_c - 1) * tc             # channels in the (ragged) last block
    # TODO(synk): for L so large that even an (8, L) block overflows VMEM, add an
    # L-tiled variant with a +/-3 halo instead of the full-length block.

    # Batch tile: as many samples per block as the target allows.
    blk_sample_bytes = tc * row_bytes
    tn = max(1, target_block // max(1, blk_sample_bytes))
    tn = min(tn, N)
    if n_tc >= 2 and N >= 2:
        # v7x: keep >= ~4 n-steps per TensorCore so prefetch/writeback overlap.
        tn = min(tn, max(1, pl.cdiv(N, 4 * n_tc)))
    tn = int(tn)
    grid_n = pl.cdiv(N, tn)

    lscr = OFF0 + pl.cdiv(L + PAD, 128) * 128    # haloed scratch row length
    block_bytes = tn * tc * L * itemsize
    scratch_bytes = tn * (2 * lscr + L) * 4
    # 2x-in + 2x-out pipeline buffers, scratch, ~2 blocks of temps, headroom.
    vmem_limit = int(max(6 * block_bytes + scratch_bytes + (4 << 20), 16 << 20))

    def kernel(x_ref, w_ref, o_ref, sum_pad, max_pad, attn_scr):
        p = pl.program_id(1)          # phase: 0 = reduce over C, 1 = apply attention
        c = pl.program_id(2)
        nc = pl.num_programs(2)

        @pl.when(jnp.logical_and(p == 0, c == 0))
        def _init():
            sum_pad[...] = jnp.zeros_like(sum_pad)
            max_pad[...] = jnp.zeros_like(max_pad)
            max_pad[:, OFF0:OFF0 + L] = jnp.full(attn_scr.shape, -jnp.inf, jnp.float32)

        def _accumulate(xv):
            # Casts are folded into the reductions: no f32 copy of the block.
            bsum = jnp.sum(xv, axis=1, dtype=jnp.float32)       # (tn, L)
            bmax = jnp.max(xv, axis=1).astype(jnp.float32)      # exact in any dtype
            sum_pad[:, OFF0:OFF0 + L] = sum_pad[:, OFF0:OFF0 + L] + bsum
            max_pad[:, OFF0:OFF0 + L] = jnp.maximum(max_pad[:, OFF0:OFF0 + L], bmax)

        if c_rem == tc:               # C % tc == 0: every channel block is full
            @pl.when(p == 0)
            def _reduce():
                _accumulate(x_ref[...])
        else:                         # statically-known ragged last channel block
            @pl.when(jnp.logical_and(p == 0, c < nc - 1))
            def _reduce_full():
                _accumulate(x_ref[...])

            @pl.when(jnp.logical_and(p == 0, c == nc - 1))
            def _reduce_ragged():
                _accumulate(x_ref[:, :c_rem, :])

        @pl.when(jnp.logical_and(p == 0, c == nc - 1))
        def _finalize():
            # 7-tap conv over [avg; max]: the zero halo around the stored rows
            # reproduces the conv's zero padding for any L (no roll, no masks).
            sp = sum_pad[...]
            mp = max_pad[...]
            acc = jnp.zeros(attn_scr.shape, jnp.float32)
            for k in range(KSIZE):                  # static unroll: 7 taps
                s = OFF0 + k - PAD
                acc = acc + (w_ref[0, k] * sp[:, s:s + L]
                             + w_ref[1, k] * mp[:, s:s + L])
            attn_scr[...] = jax.nn.sigmoid(acc)

        @pl.when(p == 1)
        def _apply():
            xv = x_ref[...]                                   # native dtype
            attn = attn_scr[...].astype(xv.dtype)             # only (tn, L) is cast
            o_ref[...] = (xv * attn[:, None, :]).astype(o_ref.dtype)

    out = pl.pallas_call(
        kernel,
        out_shape=jax.ShapeDtypeStruct((N, C, L), x.dtype),
        grid_spec=pltpu.PrefetchScalarGridSpec(
            num_scalar_prefetch=0,
            grid=(grid_n, 2, grid_c),
            in_specs=[
                pl.BlockSpec((tn, tc, L), lambda n, p, c: (n, c, 0)),
                pl.BlockSpec(memory_space=pltpu.MemorySpace.SMEM),
            ],
            # During phase 0 the output index stays at (n, 0) and is never
            # written; phase 1 writes block (n, c) before it is evicted.
            out_specs=pl.BlockSpec((tn, tc, L), lambda n, p, c: (n, p * c, 0)),
            scratch_shapes=[
                pltpu.VMEM((tn, lscr), jnp.float32),   # zero-haloed running sum
                pltpu.VMEM((tn, lscr), jnp.float32),   # zero-haloed running max
                pltpu.VMEM((tn, L), jnp.float32),      # attention row
            ],
        ),
        compiler_params=pltpu.CompilerParams(
            dimension_semantics=("parallel", "arbitrary", "arbitrary"),
            vmem_limit_bytes=vmem_limit,
        ),
    )(x, w_scaled)
    return out


def cbam_block_ref(x, conv_w):
    """Plain-JAX reference mirroring the PyTorch SpatialAttention/cbam forward."""
    avg = jnp.mean(x, axis=1, keepdims=True)          # (N, 1, L)
    mx = jnp.max(x, axis=1, keepdims=True)            # (N, 1, L)
    cat = jnp.concatenate([avg, mx], axis=1)          # (N, 2, L)
    out = lax.conv_general_dilated(
        cat, conv_w, window_strides=(1,), padding=[(PAD, PAD)],
        dimension_numbers=("NCH", "OIH", "NCH"))      # (N, 1, L)
    return x * jax.nn.sigmoid(out)


if __name__ == "__main__":
    key = jax.random.PRNGKey(0)
    kx1, kx2, kx3, kw = jax.random.split(key, 4)

    # Deterministic init of Conv1d(2, 1, 7, bias=False): shape (1, 2, 7),
    # uniform in +/- 1/sqrt(fan_in) like PyTorch's default.
    fan_in = 2 * KSIZE
    bound = 1.0 / (fan_in ** 0.5)
    conv_w = jax.random.uniform(
        kw, (1, 2, KSIZE), minval=-bound, maxval=bound, dtype=jnp.float32)

    # 1) Common fast path: full C in one block, L a multiple of 128.
    x1 = jax.random.normal(kx1, (2, 4, 128), dtype=jnp.float32)
    o1 = jax.block_until_ready(cbam_block_pallas(x1, conv_w))
    r1 = cbam_block_ref(x1, conv_w)
    assert o1.shape == x1.shape
    assert jnp.allclose(o1, r1, atol=1e-5, rtol=1e-5), "mismatch (fast path)"

    # 2) C-split (two-phase) path with a non-multiple-of-128 length
    #    (no HBM-side pad/slice; in-kernel halo reproduces the conv zero pad).
    x2 = jax.random.normal(kx2, (2, 32, 200), dtype=jnp.float32)
    o2 = jax.block_until_ready(cbam_block_pallas(x2, conv_w, force_c_split=True))
    r2 = cbam_block_ref(x2, conv_w)
    assert o2.shape == x2.shape
    assert jnp.allclose(o2, r2, atol=1e-5, rtol=1e-5), "mismatch (C-split path)"

    # 3) Ragged channel tiling (C % tc != 0) on the C-split path.
    x3 = jax.random.normal(kx3, (3, 20, 96), dtype=jnp.float32)
    o3 = jax.block_until_ready(cbam_block_pallas(x3, conv_w, force_c_split=True))
    r3 = cbam_block_ref(x3, conv_w)
    assert o3.shape == x3.shape
    assert jnp.allclose(o3, r3, atol=1e-5, rtol=1e-5), "mismatch (ragged C path)"

    print("KERNEL_OK")
</pallas_src>

<mosaic_0001>
module attributes {stable_mosaic.version = 11 : i64} {
  func.func @kernel(%arg0: i32, %arg1: i32, %arg2: i32, %arg3: memref<2x4x128xf32, #tpu.memory_space<vmem>>, %arg4: memref<2x7xf32, #tpu.memory_space<smem>>, %arg5: memref<2x4x128xf32, #tpu.memory_space<vmem>>, %arg6: memref<2x384xf32, #tpu.memory_space<vmem>>, %arg7: memref<2x384xf32, #tpu.memory_space<vmem>>, %arg8: memref<2x128xf32, #tpu.memory_space<vmem>>) attributes {dimension_semantics = [#tpu.dimension_semantics<parallel>, #tpu.dimension_semantics<arbitrary>, #tpu.dimension_semantics<arbitrary>], iteration_bounds = array<i64: 1, 2, 1>, scalar_prefetch = 0 : i64, scratch_operands = 3 : i64, tpu.core_type = #tpu.core_type<tc>, window_params = [{transform_indices = @transform_0, window_bounds = array<i64: 2, 4, 128>}, {transform_indices = @transform_1, window_bounds = array<i64: 2, 7>}, {transform_indices = @transform_2, window_bounds = array<i64: 2, 4, 128>}]} {
    %c0_i32 = arith.constant 0 : i32
    %0 = arith.cmpi eq, %arg1, %c0_i32 : i32
    %c0_i32_0 = arith.constant 0 : i32
    %1 = arith.cmpi eq, %arg2, %c0_i32_0 : i32
    %2 = arith.andi %0, %1 : i1
    %3 = arith.extui %2 : i1 to i32
    %c0_i32_1 = arith.constant 0 : i32
    %4 = arith.cmpi ne, %3, %c0_i32_1 : i32
    scf.if %4 {
      %cst = arith.constant 0.000000e+00 : f32
      %16 = vector.broadcast %cst : f32 to vector<2x384xf32>
      %c0 = arith.constant 0 : index
      %c0_8 = arith.constant 0 : index
      %17 = vector.load %arg6[%c0, %c0_8] : memref<2x384xf32, #tpu.memory_space<vmem>>, vector<2x384xf32>
      tpu.vector_store %arg6[%c0, %c0_8], %16 {strides = array<i32>} : memref<2x384xf32, #tpu.memory_space<vmem>>, vector<2x384xf32>,
      %cst_9 = arith.constant 0.000000e+00 : f32
      %18 = vector.broadcast %cst_9 : f32 to vector<2x384xf32>
      %c0_10 = arith.constant 0 : index
      %c0_11 = arith.constant 0 : index
      %19 = vector.load %arg7[%c0_10, %c0_11] : memref<2x384xf32, #tpu.memory_space<vmem>>, vector<2x384xf32>
      tpu.vector_store %arg7[%c0_10, %c0_11], %18 {strides = array<i32>} : memref<2x384xf32, #tpu.memory_space<vmem>>, vector<2x384xf32>,
      %cst_12 = arith.constant 0xFF800000 : f32
      %20 = vector.broadcast %cst_12 : f32 to vector<2x128xf32>
      %c0_13 = arith.constant 0 : index
      %c128 = arith.constant 128 : index
      %21 = vector.load %arg7[%c0_13, %c128] : memref<2x384xf32, #tpu.memory_space<vmem>>, vector<2x128xf32>
      tpu.vector_store %arg7[%c0_13, %c128], %20 {strides = array<i32>} : memref<2x384xf32, #tpu.memory_space<vmem>>, vector<2x128xf32>,
    } else {
    }
    %c0_i32_2 = arith.constant 0 : i32
    %5 = arith.cmpi eq, %arg1, %c0_i32_2 : i32
    %6 = arith.extui %5 : i1 to i32
    %c0_i32_3 = arith.constant 0 : i32
    %7 = arith.cmpi ne, %6, %c0_i32_3 : i32
    scf.if %7 {
      %c0 = arith.constant 0 : index
      %c0_8 = arith.constant 0 : index
      %c0_9 = arith.constant 0 : index
      %16 = vector.load %arg3[%c0, %c0_8, %c0_9] : memref<2x4x128xf32, #tpu.memory_space<vmem>>, vector<2x4x128xf32>
      %cst = arith.constant dense<0.000000e+00> : vector<2x128xf32>
      %17 = vector.multi_reduction <add>, %16, %cst [1] : vector<2x4x128xf32> to vector<2x128xf32>
      %cst_10 = arith.constant dense<0xFF800000> : vector<2x128xf32>
      %18 = vector.multi_reduction <maximumf>, %16, %cst_10 [1] : vector<2x4x128xf32> to vector<2x128xf32>
      %c0_11 = arith.constant 0 : index
      %c128 = arith.constant 128 : index
      %19 = vector.load %arg6[%c0_11, %c128] : memref<2x384xf32, #tpu.memory_space<vmem>>, vector<2x128xf32>
      %20 = arith.addf %19, %17 : vector<2x128xf32>
      %c0_12 = arith.constant 0 : index
      %c128_13 = arith.constant 128 : index
      %21 = vector.load %arg6[%c0_12, %c128_13] : memref<2x384xf32, #tpu.memory_space<vmem>>, vector<2x128xf32>
      tpu.vector_store %arg6[%c0_12, %c128_13], %20 {strides = array<i32>} : memref<2x384xf32, #tpu.memory_space<vmem>>, vector<2x128xf32>,
      %c0_14 = arith.constant 0 : index
      %c128_15 = arith.constant 128 : index
      %22 = vector.load %arg7[%c0_14, %c128_15] : memref<2x384xf32, #tpu.memory_space<vmem>>, vector<2x128xf32>
      %23 = arith.maximumf %22, %18 : vector<2x128xf32>
      %c0_16 = arith.constant 0 : index
      %c128_17 = arith.constant 128 : index
      %24 = vector.load %arg7[%c0_16, %c128_17] : memref<2x384xf32, #tpu.memory_space<vmem>>, vector<2x128xf32>
      tpu.vector_store %arg7[%c0_16, %c128_17], %23 {strides = array<i32>} : memref<2x384xf32, #tpu.memory_space<vmem>>, vector<2x128xf32>,
    } else {
    }
    %c0_i32_4 = arith.constant 0 : i32
    %8 = arith.cmpi eq, %arg1, %c0_i32_4 : i32
    %c0_i32_5 = arith.constant 0 : i32
    %9 = arith.cmpi eq, %arg2, %c0_i32_5 : i32
    %10 = arith.andi %8, %9 : i1
    %11 = arith.extui %10 : i1 to i32
    %c0_i32_6 = arith.constant 0 : i32
    %12 = arith.cmpi ne, %11, %c0_i32_6 : i32
    scf.if %12 {
      %c0 = arith.constant 0 : index
      %c0_8 = arith.constant 0 : index
      %16 = vector.load %arg6[%c0, %c0_8] : memref<2x384xf32, #tpu.memory_space<vmem>>, vector<2x384xf32>
      %c0_9 = arith.constant 0 : index
      %c0_10 = arith.constant 0 : index
      %17 = vector.load %arg7[%c0_9, %c0_10] : memref<2x384xf32, #tpu.memory_space<vmem>>, vector<2x384xf32>
      %cst = arith.constant 0.000000e+00 : f32
      %18 = vector.broadcast %cst : f32 to vector<2x128xf32>
      %c0_11 = arith.constant 0 : index
      %c0_12 = arith.constant 0 : index
      %19 = memref.load %arg4[%c0_11, %c0_12] : memref<2x7xf32, #tpu.memory_space<smem>>
      %20 = vector.extract_strided_slice %16 {offsets = [0, 125], sizes = [2, 128], strides = [1, 1]} : vector<2x384xf32> to vector<2x128xf32>
      %21 = vector.broadcast %19 : f32 to vector<2x128xf32>
      %22 = arith.mulf %21, %20 : vector<2x128xf32>
      %c1 = arith.constant 1 : index
      %c0_13 = arith.constant 0 : index
      %23 = memref.load %arg4[%c1, %c0_13] : memref<2x7xf32, #tpu.memory_space<smem>>
      %24 = vector.extract_strided_slice %17 {offsets = [0, 125], sizes = [2, 128], strides = [1, 1]} : vector<2x384xf32> to vector<2x128xf32>
      %25 = vector.broadcast %23 : f32 to vector<2x128xf32>
      %26 = arith.mulf %25, %24 : vector<2x128xf32>
      %27 = arith.addf %22, %26 : vector<2x128xf32>
      %28 = arith.addf %18, %27 : vector<2x128xf32>
      %c0_14 = arith.constant 0 : index
      %c1_15 = arith.constant 1 : index
      %29 = memref.load %arg4[%c0_14, %c1_15] : memref<2x7xf32, #tpu.memory_space<smem>>
      %30 = vector.extract_strided_slice %16 {offsets = [0, 126], sizes = [2, 128], strides = [1, 1]} : vector<2x384xf32> to vector<2x128xf32>
      %31 = vector.broadcast %29 : f32 to vector<2x128xf32>
      %32 = arith.mulf %31, %30 : vector<2x128xf32>
      %c1_16 = arith.constant 1 : index
      %c1_17 = arith.constant 1 : index
      %33 = memref.load %arg4[%c1_16, %c1_17] : memref<2x7xf32, #tpu.memory_space<smem>>
      %34 = vector.extract_strided_slice %17 {offsets = [0, 126], sizes = [2, 128], strides = [1, 1]} : vector<2x384xf32> to vector<2x128xf32>
      %35 = vector.broadcast %33 : f32 to vector<2x128xf32>
      %36 = arith.mulf %35, %34 : vector<2x128xf32>
      %37 = arith.addf %32, %36 : vector<2x128xf32>
      %38 = arith.addf %28, %37 : vector<2x128xf32>
      %c0_18 = arith.constant 0 : index
      %c2 = arith.constant 2 : index
      %39 = memref.load %arg4[%c0_18, %c2] : memref<2x7xf32, #tpu.memory_space<smem>>
      %40 = vector.extract_strided_slice %16 {offsets = [0, 127], sizes = [2, 128], strides = [1, 1]} : vector<2x384xf32> to vector<2x128xf32>
      %41 = vector.broadcast %39 : f32 to vector<2x128xf32>
      %42 = arith.mulf %41, %40 : vector<2x128xf32>
      %c1_19 = arith.constant 1 : index
      %c2_20 = arith.constant 2 : index
      %43 = memref.load %arg4[%c1_19, %c2_20] : memref<2x7xf32, #tpu.memory_space<smem>>
      %44 = vector.extract_strided_slice %17 {offsets = [0, 127], sizes = [2, 128], strides = [1, 1]} : vector<2x384xf32> to vector<2x128xf32>
      %45 = vector.broadcast %43 : f32 to vector<2x128xf32>
      %46 = arith.mulf %45, %44 : vector<2x128xf32>
      %47 = arith.addf %42, %46 : vector<2x128xf32>
      %48 = arith.addf %38, %47 : vector<2x128xf32>
      %c0_21 = arith.constant 0 : index
      %c3 = arith.constant 3 : index
      %49 = memref.load %arg4[%c0_21, %c3] : memref<2x7xf32, #tpu.memory_space<smem>>
      %50 = vector.extract_strided_slice %16 {offsets = [0, 128], sizes = [2, 128], strides = [1, 1]} : vector<2x384xf32> to vector<2x128xf32>
      %51 = vector.broadcast %49 : f32 to vector<2x128xf32>
      %52 = arith.mulf %51, %50 : vector<2x128xf32>
      %c1_22 = arith.constant 1 : index
      %c3_23 = arith.constant 3 : index
      %53 = memref.load %arg4[%c1_22, %c3_23] : memref<2x7xf32, #tpu.memory_space<smem>>
      %54 = vector.extract_strided_slice %17 {offsets = [0, 128], sizes = [2, 128], strides = [1, 1]} : vector<2x384xf32> to vector<2x128xf32>
      %55 = vector.broadcast %53 : f32 to vector<2x128xf32>
      %56 = arith.mulf %55, %54 : vector<2x128xf32>
      %57 = arith.addf %52, %56 : vector<2x128xf32>
      %58 = arith.addf %48, %57 : vector<2x128xf32>
      %c0_24 = arith.constant 0 : index
      %c4 = arith.constant 4 : index
      %59 = memref.load %arg4[%c0_24, %c4] : memref<2x7xf32, #tpu.memory_space<smem>>
      %60 = vector.extract_strided_slice %16 {offsets = [0, 129], sizes = [2, 128], strides = [1, 1]} : vector<2x384xf32> to vector<2x128xf32>
      %61 = vector.broadcast %59 : f32 to vector<2x128xf32>
      %62 = arith.mulf %61, %60 : vector<2x128xf32>
      %c1_25 = arith.constant 1 : index
      %c4_26 = arith.constant 4 : index
      %63 = memref.load %arg4[%c1_25, %c4_26] : memref<2x7xf32, #tpu.memory_space<smem>>
      %64 = vector.extract_strided_slice %17 {offsets = [0, 129], sizes = [2, 128], strides = [1, 1]} : vector<2x384xf32> to vector<2x128xf32>
      %65 = vector.broadcast %63 : f32 to vector<2x128xf32>
      %66 = arith.mulf %65, %64 : vector<2x128xf32>
      %67 = arith.addf %62, %66 : vector<2x128xf32>
      %68 = arith.addf %58, %67 : vector<2x128xf32>
      %c0_27 = arith.constant 0 : index
      %c5 = arith.constant 5 : index
      %69 = memref.load %arg4[%c0_27, %c5] : memref<2x7xf32, #tpu.memory_space<smem>>
      %70 = vector.extract_strided_slice %16 {offsets = [0, 130], sizes = [2, 128], strides = [1, 1]} : vector<2x384xf32> to vector<2x128xf32>
      %71 = vector.broadcast %69 : f32 to vector<2x128xf32>
      %72 = arith.mulf %71, %70 : vector<2x128xf32>
      %c1_28 = arith.constant 1 : index
      %c5_29 = arith.constant 5 : index
      %73 = memref.load %arg4[%c1_28, %c5_29] : memref<2x7xf32, #tpu.memory_space<smem>>
      %74 = vector.extract_strided_slice %17 {offsets = [0, 130], sizes = [2, 128], strides = [1, 1]} : vector<2x384xf32> to vector<2x128xf32>
      %75 = vector.broadcast %73 : f32 to vector<2x128xf32>
      %76 = arith.mulf %75, %74 : vector<2x128xf32>
      %77 = arith.addf %72, %76 : vector<2x128xf32>
      %78 = arith.addf %68, %77 : vector<2x128xf32>
      %c0_30 = arith.constant 0 : index
      %c6 = arith.constant 6 : index
      %79 = memref.load %arg4[%c0_30, %c6] : memref<2x7xf32, #tpu.memory_space<smem>>
      %80 = vector.extract_strided_slice %16 {offsets = [0, 131], sizes = [2, 128], strides = [1, 1]} : vector<2x384xf32> to vector<2x128xf32>
      %81 = vector.broadcast %79 : f32 to vector<2x128xf32>
      %82 = arith.mulf %81, %80 : vector<2x128xf32>
      %c1_31 = arith.constant 1 : index
      %c6_32 = arith.constant 6 : index
      %83 = memref.load %arg4[%c1_31, %c6_32] : memref<2x7xf32, #tpu.memory_space<smem>>
      %84 = vector.extract_strided_slice %17 {offsets = [0, 131], sizes = [2, 128], strides = [1, 1]} : vector<2x384xf32> to vector<2x128xf32>
      %85 = vector.broadcast %83 : f32 to vector<2x128xf32>
      %86 = arith.mulf %85, %84 : vector<2x128xf32>
      %87 = arith.addf %82, %86 : vector<2x128xf32>
      %88 = arith.addf %78, %87 : vector<2x128xf32>
      %89 = arith.negf %88 : vector<2x128xf32>
      %90 = math.exp %89 : vector<2x128xf32>
      %cst_33 = arith.constant 1.000000e+00 : f32
      %91 = vector.broadcast %cst_33 : f32 to vector<2x128xf32>
      %92 = arith.addf %91, %90 : vector<2x128xf32>
      %93 = arith.divf %91, %92 : vector<2x128xf32>
      %c0_34 = arith.constant 0 : index
      %c0_35 = arith.constant 0 : index
      %94 = vector.load %arg8[%c0_34, %c0_35] : memref<2x128xf32, #tpu.memory_space<vmem>>, vector<2x128xf32>
      tpu.vector_store %arg8[%c0_34, %c0_35], %93 {strides = array<i32>} : memref<2x128xf32, #tpu.memory_space<vmem>>, vector<2x128xf32>,
    } else {
    }
    %c1_i32 = arith.constant 1 : i32
    %13 = arith.cmpi eq, %arg1, %c1_i32 : i32
    %14 = arith.extui %13 : i1 to i32
    %c0_i32_7 = arith.constant 0 : i32
    %15 = arith.cmpi ne, %14, %c0_i32_7 : i32
    scf.if %15 {
      %c0 = arith.constant 0 : index
      %c0_8 = arith.constant 0 : index
      %c0_9 = arith.constant 0 : index
      %16 = vector.load %arg3[%c0, %c0_8, %c0_9] : memref<2x4x128xf32, #tpu.memory_space<vmem>>, vector<2x4x128xf32>
      %c0_10 = arith.constant 0 : index
      %c0_11 = arith.constant 0 : index
      %17 = vector.load %arg8[%c0_10, %c0_11] : memref<2x128xf32, #tpu.memory_space<vmem>>, vector<2x128xf32>
      %18 = vector.shape_cast %17 : vector<2x128xf32> to vector<2x1x128xf32>
      %19 = vector.broadcast %18 : vector<2x1x128xf32> to vector<2x4x128xf32>
      %20 = arith.mulf %16, %19 : vector<2x4x128xf32>
      %c0_12 = arith.constant 0 : index
      %c0_13 = arith.constant 0 : index
      %c0_14 = arith.constant 0 : index
      %21 = vector.load %arg5[%c0_12, %c0_13, %c0_14] : memref<2x4x128xf32, #tpu.memory_space<vmem>>, vector<2x4x128xf32>
      tpu.vector_store %arg5[%c0_12, %c0_13, %c0_14], %20 {strides = array<i32>} : memref<2x4x128xf32, #tpu.memory_space<vmem>>, vector<2x4x128xf32>,
    } else {
    }
    return
  }
  func.func @transform_0(%arg0: i32, %arg1: i32, %arg2: i32) -> (i32, i32, i32) {
    %c0_i32 = arith.constant 0 : i32
    %c0_i32_0 = arith.constant 0 : i32
    return %arg0, %arg2, %c0_i32 : i32, i32, i32
  }
  func.func @transform_1(%arg0: i32, %arg1: i32, %arg2: i32) -> (i32, i32) {
    %c0_i32 = arith.constant 0 : i32
    %c0_i32_0 = arith.constant 0 : i32
    %c0_i32_1 = arith.constant 0 : i32
    return %c0_i32, %c0_i32_0 : i32, i32
  }
  func.func @transform_2(%arg0: i32, %arg1: i32, %arg2: i32) -> (i32, i32, i32) {
    %0 = arith.muli %arg1, %arg2 : i32
    %c0_i32 = arith.constant 0 : i32
    %c0_i32_0 = arith.constant 0 : i32
    return %arg0, %0, %c0_i32 : i32, i32, i32
  }
}

</mosaic_0001>

<bundles_post_ra>
// kernel: tpu_custom_call.1
= control target key start
LH: loop header
LB: loop body
LE: loop exit
PB: predicated region body
PF: predicated region fallthrough
CT: control target
= control target key end

     0   :  { %7 = vsyncpa [#allocation6], 0  ;;  %s976_s0 = inlined_call_operand.hbm [shape: f32[2,4,128], index: 0, kind: input, shape index: {}]   ;;  %s977_s1 = inlined_call_operand.hbm [shape: f32[2,7], index: 1, kind: input, shape index: {}]   ;;  %s978_s2 = inlined_call_operand.hbm [shape: f32[2,4,128], index: 2, kind: output, shape index: {}]  }
   0x1   :  { %8 = vsyncpa [#allocation8], 0 }
   0x2   :  { %9 = vsyncpa [#allocation7], 0 }
   0x3   :  { %11 = vsyncpa [#allocation7 + $0x1], 0  ;;  %s837_s9 = smov 0   ;;  %s839_s10 = smov 0  }
   0x4   :  { %s841_s11 = smov 0  }
   0x5 LB: > { %s604_s12 = sadd.s32 4294967295, %s804_s11   ;;  %s605_s13 = sadd.s32 4294967294, %s804_s11   ;;  %s804_s11 = sphi %s841_s11, %s17_s11   ;;  %s800_s10 = sphi %s839_s10, %s984_s10   ;;  %s796_s9 = sphi %s837_s9, %s983_s9  }
   0x6   : > { %s32_s14 = sadd.s32 1, %s800_s10  ;;  %p606_p0 = scmp.ge.s32.totalorder %s804_s11, 1 }
   0x7   : > { %p34_p1 = scmp.ge.s32.totalorder %s32_s14, 2  ;;  %p120_p2 = scmp.lt.s32.totalorder %s804_s11, 3 }
   0x8   : > { %p859_p3 = scmp.eq.s32.totalorder %s604_s12, 0  ;;  %s806_s17 = smov [#allocation5]  }
   0x9   : > { %s986_s14 = smov (%p34_p1, %s32_s14), 0  ;;  %p865_p4 = pnand %p606_p0, %p120_p2 }
   0xa   : > { %s136_s18 = sshll.u32 %s806_s17, 4  ;;  %s137_s18 = int_to_ptr.vmem [resolvable:$true] %s136_s18 }
   0xb   : > { %p647_p5 = pneg %p865_p4  ;;  %s720_s20 = scalar_lea.vmem %s137_s18, 128 }
   0xc   : > { %p721_p8 = scmp.ne.s32.totalorder %s137_s18, %s720_s20  ;;  %p728_p11 = scmp.lt.s32.totalorder %s137_s18, %s137_s18 }
   0xd   : > { %p873_p6 = pnand %p859_p3, %p647_p5  ;;  %p729_p12 = scmp.lt.s32.totalorder %s720_s20, %s720_s20 }
   0xf   : > { %p711_p7 = pneg %p873_p6  ;;  %p730_p13 = por %p729_p12, %p728_p11 }
  0x11   : > { %p723_p9 = pnand %p721_p8, %p711_p7 }
  0x13   : > { %p724_p10 = pneg %p723_p9 }
  0x15   : > { %p731_p0 = pnand %p730_p13, %p724_p10 }
  0x17   : > { %734 = shalt.err (!%p731_p0)
}
  0x18   : > { %s807_s21 = smov 64   ;;  %s808_s22 = smov 4  }
  0x19   : > { %650 = dma.hbm_to_vmem [thread:$0]  (!%p873_p6), %s976_s0, 128, %s137_s18, [#allocation6], %s807_s21, %s807_s21, %s808_s22  }
  0x1a   : > { %s809_s25 = smov [#allocation9]   ;;  %161 = sbr.rel (%p865_p4) target bundleno = 520 (0x208), region = 28 }
  0x1b   : > { %653 = dma.hbm_to_smem (!%p873_p6), %s977_s1, 32, %s809_s25, [#allocation8]  }
  0x1f   : > { %783 = dma.done.wait (%p859_p3), [#allocation6], 128  }
  0x20   : > { %785 = vsyncadd (%p859_p3), [#allocation6], 4294967168 }
  0x21   : > { %787 = dma.done.wait (%p859_p3), [#allocation8], 32  }
  0x22   : > { %789 = vsyncadd (%p859_p3), [#allocation8], 4294967264 }
  0x23   : > { %171 = sfence }
  0x24   : > { %p186_p1 = scmp.eq.s32.totalorder %s796_s9, 0 }
  0x25   : > { %v810_v0 = vmov (%p186_p1), 0.0   ;;  %v811_v1 = vmov (%p186_p1), -inf  }
  0x26   : > { %191 = sbr.rel (!%p186_p1) target bundleno = 43 (0x2b), region = 40  ;;  %193 = vst [vmem:[#allocation3] sm:$0x3f] (%p186_p1), %v810_v0  ;;  %192 = vst [vmem:[#allocation2] sm:$0x3f] (%p186_p1), %v810_v0 }
  0x27   : > { %194 = vst [vmem:[#allocation3 + $0x2] sm:$0x3] (%p186_p1), %v811_v1 }
  0x2b PF: > { %p613_p2 = scmp.ne.s32.totalorder %s796_s9, 0 }
  0x2d   : > { %197 = sbr.rel (%p613_p2) target bundleno = 78 (0x4e), region = 44 }
  0x32   : > { %v198_v2 = vld [vmem:[#allocation5] sm:$0xf]  ;;  %v199_v3 = vld [vmem:[#allocation5 + $0x4] sm:$0xf]  ;;  %vm200_vm0 = vcmask 1043456   ;;  %v235_v6 = vlaneseq  ;;  %vm251_vm1 = vcmask 1041409  }
  0x33   : > { %v201_v4 = vsel %vm200_vm0, %v198_v2, 0.0  ;;  %v208_v5 = vsel %vm200_vm0, %v199_v3, 0.0  ;;  %v812_v9 = vmov 1983009808   ;;  %v215_v11 = vsel %vm200_vm0, %v198_v2, -inf }
  0x34   : > { %v202_v7 = vrot.slane %v201_v4, 4  ;;  %v209_v8 = vrot.slane %v208_v5, 4  ;;  %v233_v10 = vunpack.c.l.s4 %v812_v9  ;;  %v216_v14 = vrot.slane %v215_v11, 4  ;;  %v229_v42 = vld [vmem:[#allocation2 + $0x2] sm:$0x3] }
  0x35   : > { %v236_v15 = vshrl.u32 %v235_v6, 7  ;;  %v222_v16 = vsel %vm200_vm0, %v199_v3, -inf  ;;  %vm253_vm2 = vcmask 1043459   ;;  %vm255_vm3 = vcmask 1045509   ;;  %v262_v51 = vld [vmem:[#allocation3 + $0x2] sm:$0x3] }
  0x36   : > { %v203_v12 = vadd.f32 %v202_v7, %v201_v4  ;;  %v210_v13 = vadd.f32 %v209_v8, %v208_v5  ;;  %v234_v19 = vunpack.c.0.s8 %v233_v10  ;;  %v217_v20 = vmax.f32 %v215_v11, %v216_v14 }
  0x37   : > { %v223_v21 = vrot.slane %v222_v16, 4  ;;  %vm257_vm4 = vcmask 1047559  }
  0x38   : > { %v204_v17 = vrot.slane %v203_v12, 2  ;;  %v211_v18 = vrot.slane %v210_v13, 2  ;;  %v218_v24 = vrot.slane %v217_v20, 2  ;;  %v237_v28 = vsub.s32 %v234_v19, %v236_v15 }
  0x39   : > { %v224_v25 = vmax.f32 %v222_v16, %v223_v21 }
  0x3a   : > { %v205_v22 = vadd.f32 %v204_v17, %v203_v12  ;;  %v212_v23 = vadd.f32 %v211_v18, %v210_v13  ;;  %v219_v29 = vmax.f32 %v217_v20, %v218_v24 }
  0x3b   : > { %v225_v30 = vrot.slane %v224_v25, 2 }
  0x3c   : > { %v206_v26 = vrot.slane %v205_v22, 1  ;;  %v213_v27 = vrot.slane %v212_v23, 1  ;;  %v220_v33 = vrot.slane %v219_v29, 1 }
  0x3d   : > { %v226_v34 = vmax.f32 %v224_v25, %v225_v30 }
  0x3e   : > { %v207_v31 = vadd.f32 %v206_v26, %v205_v22  ;;  %v214_v32 = vadd.f32 %v213_v27, %v212_v23  ;;  %v221_v37 = vmax.f32 %v219_v29, %v220_v33 }
  0x3f   : > { %v227_v38 = vrot.slane %v226_v34, 1 }
  0x40   : > { %v238_v35 = vrot.slane %v207_v31, %v237_v28  ;;  %v245_v36 = vrot.slane %v214_v32, %v237_v28  ;;  %v271_v44 = vrot.slane %v221_v37, %v237_v28 }
  0x41   : > { %v228_v40 = vmax.f32 %v226_v34, %v227_v38 }
  0x42   : > { %v250_v39 = vrot.slane %v245_v36, 7 }
  0x43   : > { %v278_v45 = vrot.slane %v228_v40, %v237_v28 }
  0x44   : > { %v252_v41 = vsel %vm251_vm1, %v250_v39, %v238_v35 }
  0x45   : > { %v254_v43 = vsel %vm253_vm2, %v250_v39, %v252_v41  ;;  %v281_v48 = vrot.slane %v278_v45, 7 }
  0x46   : > { %v256_v46 = vsel %vm255_vm3, %v250_v39, %v254_v43 }
  0x47   : > { %v258_v47 = vsel %vm257_vm4, %v250_v39, %v256_v46  ;;  %v282_v50 = vsel %vm251_vm1, %v281_v48, %v271_v44 }
  0x48   : > { %v260_v49 = vadd.f32 %v258_v47, %v229_v42  ;;  %v283_v52 = vsel %vm253_vm2, %v281_v48, %v282_v50 }
  0x49   : > { %v284_v53 = vsel %vm255_vm3, %v281_v48, %v283_v52 }
  0x4a   : > { %261 = vst [vmem:[#allocation2 + $0x2] sm:$0x3] %v260_v49  ;;  %v285_v54 = vsel %vm257_vm4, %v281_v48, %v284_v53 }
  0x4b   : > { %v287_v55 = vmax.f32 %v262_v51, %v285_v54 }
  0x4d   : > { %288 = vst [vmem:[#allocation3 + $0x2] sm:$0x3] %v287_v55 }
  0x4e PF: > { %290 = sbr.rel (!%p186_p1) target bundleno = 485 (0x1e5), region = 48  ;;  %s813_s28 = smov (%p186_p1), 126   ;;  %vm327_vm5 = vcmask (%p186_p1), 1031168   ;;  %vm312_vm6 = vcmask (%p186_p1), 1039360   ;;  %vm348_vm7 = vcmask (%p186_p1), 1022976   ;;  %vm449_vm8 = vcmask (%p186_p1), 23552  }
  0x4f   : > { %s814_s29 = smov (%p186_p1), 127   ;;  %s615_s30 = sld [smem:[#allocation9 + $0x1]] (%p186_p1) }
  0x50   : > { %s616_s3 = sld [smem:[#allocation9 + $0x81]] (%p186_p1)  ;;  %s815_s8 = smov (%p186_p1), 125  }
  0x51   : > { %v291_v56 = vld [vmem:[#allocation2] sm:$0x3f] (%p186_p1)  ;;  %s617_s4 = sld [smem:[#allocation9 + $0x2]] (%p186_p1)  ;;  %s817_s23 = smov (%p186_p1), 3  }
  0x52   : > { %380 = vrot.lane.b32.xlu1 (%p186_p1), %v291_v56, %s813_s28  ;;  %354 = vrot.lane.b32.xlu0 (%p186_p1), %v291_v56, %s814_s29  ;;  %s618_s5 = sld [smem:[#allocation9 + $0x82]] (%p186_p1)  ;;  %v334_v61 = vrot.slane (%p186_p1), %v291_v56, 2 }
  0x53   : > { %s619_s6 = sld [smem:[#allocation9 + $0x3]] }
  0x54   : > { %v292_v57 = vld [vmem:[#allocation3] sm:$0x3f]  ;;  %s620_s7 = sld [smem:[#allocation9 + $0x83]] }
  0x55   : > { %v302_v58 = vstv %s615_s30  ;;  %v340_v0 = vrot.slane %v292_v57, 2  ;;  %s293_s15 = sld [smem:[#allocation9]] }
  0x56   : > { %389 = vrot.lane.b32.xlu1 %v292_v57, %s813_s28  ;;  %363 = vrot.lane.b32.xlu0 %v292_v57, %s814_s29  ;;  %v303_v59 = vmul.f32 %v302_v58, %v291_v56  ;;  %v305_v60 = vstv %s616_s3  ;;  %s614_s16 = sld [smem:[#allocation9 + $0x80]] }
  0x57   : > { %v306_v62 = vmul.f32 %v305_v60, %v292_v57  ;;  %v317_v63 = vstv %s617_s4  ;;  %s917_s17 = sld [smem:[#allocation9 + $0x4]] }
  0x58   : > { %v318_v1 = vmul.f32 %v317_v63, %v291_v56  ;;  %v320_v2 = vstv %s618_s5  ;;  %s919_s18 = sld [smem:[#allocation9 + $0x84]] }
  0x59   : > { %v307_v3 = vadd.f32 %v306_v62, %v303_v59  ;;  %v321_v4 = vmul.f32 %v320_v2, %v292_v57  ;;  %v332_v5 = vstv %s619_s6  ;;  %s921_s19 = sld [smem:[#allocation9 + $0x5]] }
  0x5a   : > { %415 = vrot.lane.b32.xlu1 %v292_v57, %s815_s8  ;;  %406 = vrot.lane.b32.xlu0 %v291_v56, %s815_s8  ;;  %v336_v6 = vmul.f32 %v334_v61, %v332_v5  ;;  %v338_v7 = vstv %s620_s7  ;;  %s923_s20 = sld [smem:[#allocation9 + $0x85]] }
  0x5b   : > { %v322_v8 = vadd.f32 %v321_v4, %v318_v1  ;;  %v342_v9 = vmul.f32 %v340_v0, %v338_v7  ;;  %v294_v11 = vstv %s293_s15  ;;  %s925_s21 = sld [smem:[#allocation9 + $0x6]] }
  0x5c   : > { %v297_v12 = vstv %s614_s16  ;;  %v295_v13 = vmul.f32 %v294_v11, %v291_v56  ;;  %s927_s22 = sld [smem:[#allocation9 + $0x86]] }
  0x5d   : > { %v343_v10 = vadd.f32 %v342_v9, %v336_v6  ;;  %v298_v14 = vmul.f32 %v297_v12, %v292_v57  ;;  %v353_v22 = vstv %s917_s17 }
  0x5e   : > { %309 = vrot.lane.b32.xlu0 %v307_v3, %s814_s29  ;;  %324 = vrot.lane.b32.xlu1 %v322_v8, %s813_s28  ;;  %v362_v23 = vstv %s919_s18 }
  0x5f   : > { %v299_v15 = vadd.f32 %v298_v14, %v295_v13  ;;  %v379_v28 = vstv %s921_s19 }
  0x60   : > { %v388_v29 = vstv %s923_s20 }
  0x61   : > { %v405_v36 = vstv %s925_s21 }
  0x62   : > { %345 = vrot.lane.b32.xlu0 %v343_v10, %s815_s8  ;;  %v414_v37 = vstv %s927_s22 }
  0xc4   : > { %v381_v16 = vpop.permute.xlu1 %380  ;;  %v355_v17 = vpop.permute.xlu0 %354 }
  0xc5   : > { %v382_v18 = vrot.slane %v381_v16, 2  ;;  %v383_v19 = vrot.slane %v381_v16, 4  ;;  %v356_v20 = vrot.slane %v355_v17, 2  ;;  %v357_v21 = vrot.slane %v355_v17, 4 }
  0xc7   : > { %v384_v24 = vsel %vm327_vm5, %v382_v18, %v383_v19  ;;  %v358_v25 = vsel %vm312_vm6, %v356_v20, %v357_v21  ;;  %v816_v18 = vmov 1983009808   ;;  %v440_v20 = vlaneseq }
  0xc8   : > { %v390_v26 = vpop.permute.xlu1 %389  ;;  %v364_v27 = vpop.permute.xlu0 %363  ;;  %v360_v40 = vmul.f32 %v358_v25, %v353_v22  ;;  %v386_v42 = vmul.f32 %v384_v24, %v379_v28  ;;  %v438_v19 = vunpack.c.l.s4 %v816_v18 }
  0xc9   : > { %v391_v30 = vrot.slane %v390_v26, 2  ;;  %v392_v31 = vrot.slane %v390_v26, 4  ;;  %v365_v32 = vrot.slane %v364_v27, 2  ;;  %v366_v33 = vrot.slane %v364_v27, 4 }
  0xca   : > { %v439_v21 = vunpack.c.0.s8 %v438_v19  ;;  %v441_v22 = vshrl.u32 %v440_v20, 7 }
  0xcb   : > { %v393_v34 = vsel %vm327_vm5, %v391_v30, %v392_v31  ;;  %v367_v35 = vsel %vm312_vm6, %v365_v32, %v366_v33 }
  0xcc   : > { %v416_v38 = vpop.permute.xlu1 %415  ;;  %v407_v39 = vpop.permute.xlu0 %406  ;;  %v369_v41 = vmul.f32 %v367_v35, %v362_v23  ;;  %v395_v43 = vmul.f32 %v393_v34, %v388_v29  ;;  %v442_v23 = vsub.s32 %v439_v21, %v441_v22 }
  0xcd   : > { %v417_v44 = vrot.slane %v416_v38, 2  ;;  %v418_v45 = vrot.slane %v416_v38, 4  ;;  %v408_v46 = vrot.slane %v407_v39, 2  ;;  %v409_v47 = vrot.slane %v407_v39, 4 }
  0xce   : > { %v370_v48 = vadd.f32 %v369_v41, %v360_v40  ;;  %v396_v49 = vadd.f32 %v395_v43, %v386_v42 }
  0xcf   : > { %v419_v50 = vsel %vm348_vm7, %v417_v44, %v418_v45  ;;  %v410_v51 = vsel %vm348_vm7, %v408_v46, %v409_v47 }
  0xd0   : > { %372 = vrot.lane.b32.xlu1 %v370_v48, %s815_s8  ;;  %398 = vrot.lane.b32.xlu0 %v396_v49, %s815_s8  ;;  %v412_v52 = vmul.f32 %v410_v51, %v405_v36  ;;  %v421_v53 = vmul.f32 %v419_v50, %v414_v37  ;;  %v310_v54 = vpop.permute.xlu0 %309  ;;  %v325_v57 = vpop.permute.xlu1 %324 }
  0xd1   : > { %v311_v55 = vrot.slane %v310_v54, 2  ;;  %v326_v59 = vrot.slane %v325_v57, 2 }
  0xd2   : > { %v422_v56 = vadd.f32 %v421_v53, %v412_v52 }
  0xd3   : > { %v313_v58 = vsel %vm312_vm6, %v310_v54, %v311_v55  ;;  %v328_v61 = vsel %vm327_vm5, %v325_v57, %v326_v59 }
  0xd4   : > { %424 = vrot.lane.b32.xlu1 %v422_v56, %s815_s8  ;;  %v315_v60 = vadd.f32 %v313_v58, %v299_v15  ;;  %v346_v63 = vpop.permute.xlu0 %345 }
  0xd5   : > { %v347_v0 = vrot.slane %v346_v63, 6 }
  0xd6   : > { %v330_v62 = vadd.f32 %v328_v61, %v315_v60 }
  0xd7   : > { %v349_v1 = vsel %vm348_vm7, %v347_v0, %v346_v63 }
  0xd8   : > { %v351_v6 = vadd.f32 %v349_v1, %v330_v62 }
 0x142   : > { %v373_v2 = vpop.permute.xlu1 %372  ;;  %v399_v3 = vpop.permute.xlu0 %398 }
 0x143   : > { %v374_v4 = vrot.slane %v373_v2, 6  ;;  %v400_v5 = vrot.slane %v399_v3, 6 }
 0x145   : > { %v375_v7 = vsel %vm348_vm7, %v374_v4, %v373_v2  ;;  %v401_v10 = vsel %vm348_vm7, %v400_v5, %v399_v3 }
 0x146   : > { %v377_v8 = vadd.f32 %v375_v7, %v351_v6  ;;  %v425_v9 = vpop.permute.xlu1 %424 }
 0x147   : > { %v426_v11 = vrot.slane %v425_v9, 6 }
 0x148   : > { %v403_v12 = vadd.f32 %v401_v10, %v377_v8 }
 0x149   : > { %v427_v13 = vsel %vm348_vm7, %v426_v11, %v425_v9 }
 0x14a   : > { %v429_v14 = vadd.f32 %v427_v13, %v403_v12 }
 0x14c   : > { %v627_v15 = vmul.f32 -1.442695, %v429_v14 }
 0x14e   : > { %705 = vpow2.f32 %v627_v15 }
 0x15b   : > { %v706_v16 = vpop.eup %705 }
 0x15c   : > { %v433_v17 = vadd.f32 1.0, %v706_v16 }
 0x15e   : > { %707 = vrcp.f32 %v433_v17 }
 0x16b   : > { %v708_v24 = vpop.eup %707 }
 0x16c   : > { %v443_v25 = vrot.slane %v708_v24, %v442_v23 }
 0x16e   : > { %445 = vrot.lane.b32.xlu0 %v443_v25, %s817_s23  ;;  %v444_v26 = vcombine.high %v443_v25, %v443_v25 }
 0x170   : > { %447 = vrot.lane.b32.xlu1 %v444_v26, %s817_s23 }
 0x1e0   : > { %v446_v27 = vpop.permute.xlu0 %445 }
 0x1e2   : > { %v448_v28 = vpop.permute.xlu1 %447 }
 0x1e3   : > { %v450_v29 = vsel %vm449_vm8, %v446_v27, %v448_v28 }
 0x1e4   : > { %452 = vst [vmem:[#allocation4] sm:$0x3] %v450_v29 }
 0x1e5 PF: > { %p628_p3 = scmp.ne.s32.totalorder %s796_s9, 1 }
 0x1e7   : > { %456 = sbr.rel (%p628_p3) target bundleno = 506 (0x1fa), region = 52 }
 0x1ec   : > { %v472_v30 = vlaneseq  ;;  %v629_v31 = vld.sshfl [vmem:[#allocation4] sm:$0x11 pattern:$0x75316420]  ;;  %v818_v32 = vmov 1966171168  }
 0x1ed   : > { %v470_v33 = vunpack.c.l.s4 %v818_v32  ;;  %v468_v36 = vcombine.high %v629_v31, %v629_v31  ;;  %v457_v41 = vld [vmem:[#allocation5] sm:$0xf]  ;;  %v458_v42 = vld [vmem:[#allocation5 + $0x4] sm:$0xf] }
 0x1ee   : > { %v473_v34 = vshrl.u32 %v472_v30, 7 }
 0x1ef   : > { %v471_v35 = vunpack.c.0.s8 %v470_v33 }
 0x1f0   : > { %v485_v38 = vsub.s32 0, %v473_v34 }
 0x1f1   : > { %v474_v37 = vsub.s32 %v471_v35, %v473_v34 }
 0x1f3   : > { %v475_v39 = vrot.slane %v629_v31, %v474_v37  ;;  %v482_v40 = vrot.slane %v468_v36, %v474_v37 }
 0x1f5   : > { %v486_v43 = vrot.slane %v475_v39, %v485_v38  ;;  %v490_v44 = vrot.slane %v482_v40, %v485_v38 }
 0x1f7   : > { %v493_v45 = vmul.f32 %v486_v43, %v457_v41  ;;  %v494_v46 = vmul.f32 %v490_v44, %v458_v42 }
 0x1f9   : > { %495 = vst [vmem:[#allocation10] sm:$0xf] %v493_v45  ;;  %496 = vst [vmem:[#allocation10 + $0x4] sm:$0xf] %v494_v46 }
 0x1fa PF: > { %p953_p4 = scmp.eq.s32.totalorder %s604_s12, 1  ;;  %s819_s24 = smov [#allocation10]  }
 0x1fb   : > { %s513_s25 = sshll.u32 %s819_s24, 4  ;;  %s514_s25 = int_to_ptr.vmem [resolvable:$true] %s513_s25 }
 0x1fc   : > { %s746_s26 = scalar_lea.vmem %s514_s25, 128  ;;  %s752_s27 = scalar_lea.vmem %s514_s25, 256 }
 0x1fd   : > { %p747_p5 = scmp.ne.s32.totalorder %s514_s25, %s746_s26  ;;  %p753_p8 = scmp.lt.s32.totalorder %s514_s25, %s514_s25 }
 0x1fe   : > { %p754_p9 = scmp.lt.s32.totalorder %s752_s27, %s746_s26 }
 0x1ff   : > { %p748_p6 = pnand %p747_p5, %p953_p4 }
 0x200   : > { %p755_p10 = por %p754_p9, %p753_p8 }
 0x201   : > { %p749_p7 = pneg %p748_p6 }
 0x203   : > { %p756_p11 = pnand %p755_p10, %p749_p7 }
 0x205   : > { %759 = shalt.err (!%p756_p11)
}
 0x206   : > { %s820_s28 = smov 64   ;;  %s821_s12 = smov 4  }
 0x207   : > { %644 = dma.vmem_to_hbm [thread:$0]  (%p953_p4), %s514_s25, 128, %s978_s2, [#allocation7], %s820_s28, %s820_s28, %s821_s12  }
 0x208 PF: > { %p663_p12 = scmp.ge.s32.totalorder %s804_s11, 2  ;;  %p664_p13 = scmp.eq.s32.totalorder %s605_s13, 1 }
 0x20a   : > { %p655_p0 = pnand %p664_p13, %p663_p12 }
 0x20c   : > { %p656_p1 = pneg %p655_p0 }
 0x20e   : > { %791 = dma.done.wait (%p656_p1), [#allocation7], 128  }
 0x20f   : > { %793 = vsyncadd (%p656_p1), [#allocation7], 4294967168  ;;  %s17_s11 = sadd.s32 1, %s804_s11   ;;  %s983_s9 = smov %s800_s10 }
 0x210   : > { %p14_p2 = scmp.ge.s32.totalorder %s17_s11, 4   ;;  %s984_s10 = smov %s986_s14 }
 0x212   :  { %16 = sbr.rel (!%p14_p2) target bundleno = 5 (0x5), region = 87 }
 0x217   :  { %534 = vsyncpa [#allocation6], 1 }
 0x218   :  { %536 = vsyncpa [#allocation6 + $0x1], 1 }
 0x219   :  { %537 = vsyncpa [#allocation7], 1 }
 0x21a   :  { %539 = vsyncpa [#allocation7 + $0x1], 1 }
 0x21b   :  { %540 = vsyncpa [#allocation8], 1 }
 0x21c   :  { %542 = vsyncpa [#allocation8 + $0x1], 1 }

</bundles_post_ra>
